<compile_context>
chip_gen: v6e
topology: v6e:2x2x1
jax: 0.10.0
libtpu: 0.0.40
codegen_flags: <defaults>
</compile_context>

<pallas_src>
import math
from functools import partial

import jax
import jax.numpy as jnp
from jax.experimental import pallas as pl
from jax.experimental.pallas import tpu as pltpu

VOCAB = 256
D_MODEL = 128
PADDING_IDX = 0
BATCH = 2
SEQ = 8
TOKENS_PER_TILE = 8     # sublane-aligned token tile (multiple of 8)


# --------------------------------- kernel ------------------------------------
def _gather_embed_kernel(ids_smem, table_hbm, out_ref, buf, sems, *,
                         tokens_per_tile, vocab, scale):
    """Gather `tokens_per_tile` embedding rows from HBM, scale, store."""
    tile = pl.program_id(0)
    base = tile * tokens_per_tile

    # Issue one row DMA per token in this tile.  Static unroll keeps all
    # copies in flight before we wait on any of them.
    for t in range(tokens_per_tile):
        row = ids_smem[base + t]                    # scalar read from SMEM
        row = jnp.clip(row, 0, vocab - 1)           # guard OOB ids
        pltpu.make_async_copy(
            table_hbm.at[pl.ds(row, 1), :],         # one table row in HBM
            buf.at[pl.ds(t, 1), :],                 # VMEM gather buffer row
            sems.at[t],
        ).start()

    for t in range(tokens_per_tile):
        pltpu.make_async_copy(
            table_hbm.at[pl.ds(0, 1), :],
            buf.at[pl.ds(t, 1), :],
            sems.at[t],
        ).wait()

    # Scale in f32, store the lane-dense (tokens_per_tile, d_model) block.
    out_ref[...] = (buf[...].astype(jnp.float32) * scale).astype(out_ref.dtype)


# ------------------------------ host wrapper ----------------------------------
def transformer_embedding(token_ids, table, *, tokens_per_tile=TOKENS_PER_TILE):
    """token_ids: int [B, T]; table: f32 [V, d_model] -> f32 [B, T, d_model]."""
    B, T = token_ids.shape
    V, dm = table.shape
    n = B * T
    assert n % tokens_per_tile == 0, "token count must tile evenly"
    ids_flat = token_ids.reshape(n).astype(jnp.int32)
    scale = math.sqrt(float(dm))

    kernel = partial(_gather_embed_kernel,
                     tokens_per_tile=tokens_per_tile, vocab=V, scale=scale)

    out_flat = pl.pallas_call(
        kernel,
        out_shape=jax.ShapeDtypeStruct((n, dm), table.dtype),
        grid_spec=pltpu.PrefetchScalarGridSpec(
            num_scalar_prefetch=1,                  # ids -> SMEM
            grid=(n // tokens_per_tile,),
            in_specs=[
                pl.BlockSpec(memory_space=pl.ANY),  # table stays in HBM
            ],
            out_specs=pl.BlockSpec((tokens_per_tile, dm),
                                   lambda i, ids: (i, 0)),
            scratch_shapes=[
                pltpu.VMEM((tokens_per_tile, dm), table.dtype),   # gather buf
                pltpu.SemaphoreType.DMA((tokens_per_tile,)),      # per-row sems
            ],
        ),
        compiler_params=pltpu.CompilerParams(
            dimension_semantics=("parallel",),      # token tiles are independent
        ),
    )(ids_flat, table)
    return out_flat.reshape(B, T, dm)


# --------------------------- params / reference -------------------------------
def init_embedding_table(key, vocab, d_model, padding_idx):
    # nn.Embedding default init: N(0, 1); the padding_idx row is zeroed.
    w = jax.random.normal(key, (vocab, d_model), jnp.float32)
    return w.at[padding_idx].set(0.0)


def ref_transformer_embedding(token_ids, table):
    return jnp.take(table, token_ids, axis=0) * math.sqrt(table.shape[1])


# ---------------------------------- main ---------------------------------------
if __name__ == "__main__":
    key = jax.random.PRNGKey(0)
    k_tab, k_ids = jax.random.split(key)

    table = init_embedding_table(k_tab, VOCAB, D_MODEL, PADDING_IDX)
    token_ids = jax.random.randint(k_ids, (BATCH, SEQ), 1, VOCAB, jnp.int32)
    # exercise the padding_idx path
    token_ids = token_ids.at[0, SEQ - 1].set(PADDING_IDX)
    token_ids = token_ids.at[1, SEQ - 2:].set(PADDING_IDX)

    out = transformer_embedding(token_ids, table)
    out = jax.block_until_ready(out)

    ref = ref_transformer_embedding(token_ids, table)
    ref = jax.block_until_ready(ref)

    assert out.shape == (BATCH, SEQ, D_MODEL)
    assert bool(jnp.all(jnp.isfinite(out)))
    assert bool(jnp.allclose(out, ref, rtol=1e-5, atol=1e-5)), (
        float(jnp.max(jnp.abs(out - ref))))
    # padded tokens must embed to exactly zero (zeroed padding row)
    assert bool(jnp.all(out[0, SEQ - 1] == 0.0))
    assert bool(jnp.all(out[1, SEQ - 2:] == 0.0))

    print("KERNEL_OK")
</pallas_src>

<mosaic_0001>
module attributes {stable_mosaic.version = 11 : i64} {
  func.func @_gather_embed_kernel(%arg0: i32, %arg1: memref<16xi32, #tpu.memory_space<smem>>, %arg2: memref<256x128xf32, #tpu.memory_space<any>>, %arg3: memref<8x128xf32, #tpu.memory_space<vmem>>, %arg4: memref<8x128xf32, #tpu.memory_space<vmem>>, %arg5: memref<8x!tpu.dma_semaphore, #tpu.memory_space<semaphore_mem>>) attributes {dimension_semantics = [#tpu.dimension_semantics<parallel>], iteration_bounds = array<i64: 2>, scalar_prefetch = 1 : i64, scratch_operands = 2 : i64, tpu.core_type = #tpu.core_type<tc>, window_params = [{}, {transform_indices = @transform_1, window_bounds = array<i64: 8, 128>}]} {
    %c8_i32 = arith.constant 8 : i32
    %0 = arith.muli %arg0, %c8_i32 : i32
    %c0_i32 = arith.constant 0 : i32
    %1 = arith.addi %0, %c0_i32 : i32
    %2 = arith.index_cast %1 : i32 to index
    %3 = memref.load %arg1[%2] : memref<16xi32, #tpu.memory_space<smem>>
    %c0_i32_0 = arith.constant 0 : i32
    %c255_i32 = arith.constant 255 : i32
    %4 = arith.maxsi %c0_i32_0, %3 : i32
    %5 = arith.minsi %c255_i32, %4 : i32
    %c0_i32_1 = arith.constant 0 : i32
    %c0_i32_2 = arith.constant 0 : i32
    %6 = tpu.memref_slice %arg2[%5, %c0_i32_2] : memref<256x128xf32, #tpu.memory_space<any>> -> memref<1x128xf32, #tpu.memory_space<any>>
    %c0_i32_3 = arith.constant 0 : i32
    %c0_i32_4 = arith.constant 0 : i32
    %7 = tpu.memref_slice %arg4[%c0_i32_3, %c0_i32_4] : memref<8x128xf32, #tpu.memory_space<vmem>> -> memref<1x128xf32, #tpu.memory_space<vmem>>
    %8 = tpu.memref_slice %arg5[%c0_i32_1] : memref<8x!tpu.dma_semaphore, #tpu.memory_space<semaphore_mem>> -> memref<1x!tpu.dma_semaphore, #tpu.memory_space<semaphore_mem>>
    %9 = tpu.memref_squeeze %8 : memref<1x!tpu.dma_semaphore, #tpu.memory_space<semaphore_mem>> -> memref<!tpu.dma_semaphore, #tpu.memory_space<semaphore_mem>>
    tpu.enqueue_dma source(%6 : memref<1x128xf32, #tpu.memory_space<any>>) target(%7 : memref<1x128xf32, #tpu.memory_space<vmem>>) target_semaphore(%9 : memref<!tpu.dma_semaphore, #tpu.memory_space<semaphore_mem>>)
    %c1_i32 = arith.constant 1 : i32
    %10 = arith.addi %0, %c1_i32 : i32
    %11 = arith.index_cast %10 : i32 to index
    %12 = memref.load %arg1[%11] : memref<16xi32, #tpu.memory_space<smem>>
    %c0_i32_5 = arith.constant 0 : i32
    %c255_i32_6 = arith.constant 255 : i32
    %13 = arith.maxsi %c0_i32_5, %12 : i32
    %14 = arith.minsi %c255_i32_6, %13 : i32
    %c1_i32_7 = arith.constant 1 : i32
    %c0_i32_8 = arith.constant 0 : i32
    %15 = tpu.memref_slice %arg2[%14, %c0_i32_8] : memref<256x128xf32, #tpu.memory_space<any>> -> memref<1x128xf32, #tpu.memory_space<any>>
    %c1_i32_9 = arith.constant 1 : i32
    %c0_i32_10 = arith.constant 0 : i32
    %16 = tpu.memref_slice %arg4[%c1_i32_9, %c0_i32_10] : memref<8x128xf32, #tpu.memory_space<vmem>> -> memref<1x128xf32, #tpu.memory_space<vmem>>
    %17 = tpu.memref_slice %arg5[%c1_i32_7] : memref<8x!tpu.dma_semaphore, #tpu.memory_space<semaphore_mem>> -> memref<1x!tpu.dma_semaphore, #tpu.memory_space<semaphore_mem>>
    %18 = tpu.memref_squeeze %17 : memref<1x!tpu.dma_semaphore, #tpu.memory_space<semaphore_mem>> -> memref<!tpu.dma_semaphore, #tpu.memory_space<semaphore_mem>>
    tpu.enqueue_dma source(%15 : memref<1x128xf32, #tpu.memory_space<any>>) target(%16 : memref<1x128xf32, #tpu.memory_space<vmem>>) target_semaphore(%18 : memref<!tpu.dma_semaphore, #tpu.memory_space<semaphore_mem>>)
    %c2_i32 = arith.constant 2 : i32
    %19 = arith.addi %0, %c2_i32 : i32
    %20 = arith.index_cast %19 : i32 to index
    %21 = memref.load %arg1[%20] : memref<16xi32, #tpu.memory_space<smem>>
    %c0_i32_11 = arith.constant 0 : i32
    %c255_i32_12 = arith.constant 255 : i32
    %22 = arith.maxsi %c0_i32_11, %21 : i32
    %23 = arith.minsi %c255_i32_12, %22 : i32
    %c2_i32_13 = arith.constant 2 : i32
    %c0_i32_14 = arith.constant 0 : i32
    %24 = tpu.memref_slice %arg2[%23, %c0_i32_14] : memref<256x128xf32, #tpu.memory_space<any>> -> memref<1x128xf32, #tpu.memory_space<any>>
    %c2_i32_15 = arith.constant 2 : i32
    %c0_i32_16 = arith.constant 0 : i32
    %25 = tpu.memref_slice %arg4[%c2_i32_15, %c0_i32_16] : memref<8x128xf32, #tpu.memory_space<vmem>> -> memref<1x128xf32, #tpu.memory_space<vmem>>
    %26 = tpu.memref_slice %arg5[%c2_i32_13] : memref<8x!tpu.dma_semaphore, #tpu.memory_space<semaphore_mem>> -> memref<1x!tpu.dma_semaphore, #tpu.memory_space<semaphore_mem>>
    %27 = tpu.memref_squeeze %26 : memref<1x!tpu.dma_semaphore, #tpu.memory_space<semaphore_mem>> -> memref<!tpu.dma_semaphore, #tpu.memory_space<semaphore_mem>>
    tpu.enqueue_dma source(%24 : memref<1x128xf32, #tpu.memory_space<any>>) target(%25 : memref<1x128xf32, #tpu.memory_space<vmem>>) target_semaphore(%27 : memref<!tpu.dma_semaphore, #tpu.memory_space<semaphore_mem>>)
    %c3_i32 = arith.constant 3 : i32
    %28 = arith.addi %0, %c3_i32 : i32
    %29 = arith.index_cast %28 : i32 to index
    %30 = memref.load %arg1[%29] : memref<16xi32, #tpu.memory_space<smem>>
    %c0_i32_17 = arith.constant 0 : i32
    %c255_i32_18 = arith.constant 255 : i32
    %31 = arith.maxsi %c0_i32_17, %30 : i32
    %32 = arith.minsi %c255_i32_18, %31 : i32
    %c3_i32_19 = arith.constant 3 : i32
    %c0_i32_20 = arith.constant 0 : i32
    %33 = tpu.memref_slice %arg2[%32, %c0_i32_20] : memref<256x128xf32, #tpu.memory_space<any>> -> memref<1x128xf32, #tpu.memory_space<any>>
    %c3_i32_21 = arith.constant 3 : i32
    %c0_i32_22 = arith.constant 0 : i32
    %34 = tpu.memref_slice %arg4[%c3_i32_21, %c0_i32_22] : memref<8x128xf32, #tpu.memory_space<vmem>> -> memref<1x128xf32, #tpu.memory_space<vmem>>
    %35 = tpu.memref_slice %arg5[%c3_i32_19] : memref<8x!tpu.dma_semaphore, #tpu.memory_space<semaphore_mem>> -> memref<1x!tpu.dma_semaphore, #tpu.memory_space<semaphore_mem>>
    %36 = tpu.memref_squeeze %35 : memref<1x!tpu.dma_semaphore, #tpu.memory_space<semaphore_mem>> -> memref<!tpu.dma_semaphore, #tpu.memory_space<semaphore_mem>>
    tpu.enqueue_dma source(%33 : memref<1x128xf32, #tpu.memory_space<any>>) target(%34 : memref<1x128xf32, #tpu.memory_space<vmem>>) target_semaphore(%36 : memref<!tpu.dma_semaphore, #tpu.memory_space<semaphore_mem>>)
    %c4_i32 = arith.constant 4 : i32
    %37 = arith.addi %0, %c4_i32 : i32
    %38 = arith.index_cast %37 : i32 to index
    %39 = memref.load %arg1[%38] : memref<16xi32, #tpu.memory_space<smem>>
    %c0_i32_23 = arith.constant 0 : i32
    %c255_i32_24 = arith.constant 255 : i32
    %40 = arith.maxsi %c0_i32_23, %39 : i32
    %41 = arith.minsi %c255_i32_24, %40 : i32
    %c4_i32_25 = arith.constant 4 : i32
    %c0_i32_26 = arith.constant 0 : i32
    %42 = tpu.memref_slice %arg2[%41, %c0_i32_26] : memref<256x128xf32, #tpu.memory_space<any>> -> memref<1x128xf32, #tpu.memory_space<any>>
    %c4_i32_27 = arith.constant 4 : i32
    %c0_i32_28 = arith.constant 0 : i32
    %43 = tpu.memref_slice %arg4[%c4_i32_27, %c0_i32_28] : memref<8x128xf32, #tpu.memory_space<vmem>> -> memref<1x128xf32, #tpu.memory_space<vmem>>
    %44 = tpu.memref_slice %arg5[%c4_i32_25] : memref<8x!tpu.dma_semaphore, #tpu.memory_space<semaphore_mem>> -> memref<1x!tpu.dma_semaphore, #tpu.memory_space<semaphore_mem>>
    %45 = tpu.memref_squeeze %44 : memref<1x!tpu.dma_semaphore, #tpu.memory_space<semaphore_mem>> -> memref<!tpu.dma_semaphore, #tpu.memory_space<semaphore_mem>>
    tpu.enqueue_dma source(%42 : memref<1x128xf32, #tpu.memory_space<any>>) target(%43 : memref<1x128xf32, #tpu.memory_space<vmem>>) target_semaphore(%45 : memref<!tpu.dma_semaphore, #tpu.memory_space<semaphore_mem>>)
    %c5_i32 = arith.constant 5 : i32
    %46 = arith.addi %0, %c5_i32 : i32
    %47 = arith.index_cast %46 : i32 to index
    %48 = memref.load %arg1[%47] : memref<16xi32, #tpu.memory_space<smem>>
    %c0_i32_29 = arith.constant 0 : i32
    %c255_i32_30 = arith.constant 255 : i32
    %49 = arith.maxsi %c0_i32_29, %48 : i32
    %50 = arith.minsi %c255_i32_30, %49 : i32
    %c5_i32_31 = arith.constant 5 : i32
    %c0_i32_32 = arith.constant 0 : i32
    %51 = tpu.memref_slice %arg2[%50, %c0_i32_32] : memref<256x128xf32, #tpu.memory_space<any>> -> memref<1x128xf32, #tpu.memory_space<any>>
    %c5_i32_33 = arith.constant 5 : i32
    %c0_i32_34 = arith.constant 0 : i32
    %52 = tpu.memref_slice %arg4[%c5_i32_33, %c0_i32_34] : memref<8x128xf32, #tpu.memory_space<vmem>> -> memref<1x128xf32, #tpu.memory_space<vmem>>
    %53 = tpu.memref_slice %arg5[%c5_i32_31] : memref<8x!tpu.dma_semaphore, #tpu.memory_space<semaphore_mem>> -> memref<1x!tpu.dma_semaphore, #tpu.memory_space<semaphore_mem>>
    %54 = tpu.memref_squeeze %53 : memref<1x!tpu.dma_semaphore, #tpu.memory_space<semaphore_mem>> -> memref<!tpu.dma_semaphore, #tpu.memory_space<semaphore_mem>>
    tpu.enqueue_dma source(%51 : memref<1x128xf32, #tpu.memory_space<any>>) target(%52 : memref<1x128xf32, #tpu.memory_space<vmem>>) target_semaphore(%54 : memref<!tpu.dma_semaphore, #tpu.memory_space<semaphore_mem>>)
    %c6_i32 = arith.constant 6 : i32
    %55 = arith.addi %0, %c6_i32 : i32
    %56 = arith.index_cast %55 : i32 to index
    %57 = memref.load %arg1[%56] : memref<16xi32, #tpu.memory_space<smem>>
    %c0_i32_35 = arith.constant 0 : i32
    %c255_i32_36 = arith.constant 255 : i32
    %58 = arith.maxsi %c0_i32_35, %57 : i32
    %59 = arith.minsi %c255_i32_36, %58 : i32
    %c6_i32_37 = arith.constant 6 : i32
    %c0_i32_38 = arith.constant 0 : i32
    %60 = tpu.memref_slice %arg2[%59, %c0_i32_38] : memref<256x128xf32, #tpu.memory_space<any>> -> memref<1x128xf32, #tpu.memory_space<any>>
    %c6_i32_39 = arith.constant 6 : i32
    %c0_i32_40 = arith.constant 0 : i32
    %61 = tpu.memref_slice %arg4[%c6_i32_39, %c0_i32_40] : memref<8x128xf32, #tpu.memory_space<vmem>> -> memref<1x128xf32, #tpu.memory_space<vmem>>
    %62 = tpu.memref_slice %arg5[%c6_i32_37] : memref<8x!tpu.dma_semaphore, #tpu.memory_space<semaphore_mem>> -> memref<1x!tpu.dma_semaphore, #tpu.memory_space<semaphore_mem>>
    %63 = tpu.memref_squeeze %62 : memref<1x!tpu.dma_semaphore, #tpu.memory_space<semaphore_mem>> -> memref<!tpu.dma_semaphore, #tpu.memory_space<semaphore_mem>>
    tpu.enqueue_dma source(%60 : memref<1x128xf32, #tpu.memory_space<any>>) target(%61 : memref<1x128xf32, #tpu.memory_space<vmem>>) target_semaphore(%63 : memref<!tpu.dma_semaphore, #tpu.memory_space<semaphore_mem>>)
    %c7_i32 = arith.constant 7 : i32
    %64 = arith.addi %0, %c7_i32 : i32
    %65 = arith.index_cast %64 : i32 to index
    %66 = memref.load %arg1[%65] : memref<16xi32, #tpu.memory_space<smem>>
    %c0_i32_41 = arith.constant 0 : i32
    %c255_i32_42 = arith.constant 255 : i32
    %67 = arith.maxsi %c0_i32_41, %66 : i32
    %68 = arith.minsi %c255_i32_42, %67 : i32
    %c7_i32_43 = arith.constant 7 : i32
    %c0_i32_44 = arith.constant 0 : i32
    %69 = tpu.memref_slice %arg2[%68, %c0_i32_44] : memref<256x128xf32, #tpu.memory_space<any>> -> memref<1x128xf32, #tpu.memory_space<any>>
    %c7_i32_45 = arith.constant 7 : i32
    %c0_i32_46 = arith.constant 0 : i32
    %70 = tpu.memref_slice %arg4[%c7_i32_45, %c0_i32_46] : memref<8x128xf32, #tpu.memory_space<vmem>> -> memref<1x128xf32, #tpu.memory_space<vmem>>
    %71 = tpu.memref_slice %arg5[%c7_i32_43] : memref<8x!tpu.dma_semaphore, #tpu.memory_space<semaphore_mem>> -> memref<1x!tpu.dma_semaphore, #tpu.memory_space<semaphore_mem>>
    %72 = tpu.memref_squeeze %71 : memref<1x!tpu.dma_semaphore, #tpu.memory_space<semaphore_mem>> -> memref<!tpu.dma_semaphore, #tpu.memory_space<semaphore_mem>>
    tpu.enqueue_dma source(%69 : memref<1x128xf32, #tpu.memory_space<any>>) target(%70 : memref<1x128xf32, #tpu.memory_space<vmem>>) target_semaphore(%72 : memref<!tpu.dma_semaphore, #tpu.memory_space<semaphore_mem>>)
    %c0_i32_47 = arith.constant 0 : i32
    %c0_i32_48 = arith.constant 0 : i32
    %c0_i32_49 = arith.constant 0 : i32
    %73 = tpu.memref_slice %arg2[%c0_i32_48, %c0_i32_49] : memref<256x128xf32, #tpu.memory_space<any>> -> memref<1x128xf32, #tpu.memory_space<any>>
    %c0_i32_50 = arith.constant 0 : i32
    %c0_i32_51 = arith.constant 0 : i32
    %74 = tpu.memref_slice %arg4[%c0_i32_50, %c0_i32_51] : memref<8x128xf32, #tpu.memory_space<vmem>> -> memref<1x128xf32, #tpu.memory_space<vmem>>
    %75 = tpu.memref_slice %arg5[%c0_i32_47] : memref<8x!tpu.dma_semaphore, #tpu.memory_space<semaphore_mem>> -> memref<1x!tpu.dma_semaphore, #tpu.memory_space<semaphore_mem>>
    %76 = tpu.memref_squeeze %75 : memref<1x!tpu.dma_semaphore, #tpu.memory_space<semaphore_mem>> -> memref<!tpu.dma_semaphore, #tpu.memory_space<semaphore_mem>>
    tpu.wait_dma2 semaphore(%76 : memref<!tpu.dma_semaphore, #tpu.memory_space<semaphore_mem>>) src(%73 : memref<1x128xf32, #tpu.memory_space<any>>) dst(%74 : memref<1x128xf32, #tpu.memory_space<vmem>>)
    %c1_i32_52 = arith.constant 1 : i32
    %c0_i32_53 = arith.constant 0 : i32
    %c0_i32_54 = arith.constant 0 : i32
    %77 = tpu.memref_slice %arg2[%c0_i32_53, %c0_i32_54] : memref<256x128xf32, #tpu.memory_space<any>> -> memref<1x128xf32, #tpu.memory_space<any>>
    %c1_i32_55 = arith.constant 1 : i32
    %c0_i32_56 = arith.constant 0 : i32
    %78 = tpu.memref_slice %arg4[%c1_i32_55, %c0_i32_56] : memref<8x128xf32, #tpu.memory_space<vmem>> -> memref<1x128xf32, #tpu.memory_space<vmem>>
    %79 = tpu.memref_slice %arg5[%c1_i32_52] : memref<8x!tpu.dma_semaphore, #tpu.memory_space<semaphore_mem>> -> memref<1x!tpu.dma_semaphore, #tpu.memory_space<semaphore_mem>>
    %80 = tpu.memref_squeeze %79 : memref<1x!tpu.dma_semaphore, #tpu.memory_space<semaphore_mem>> -> memref<!tpu.dma_semaphore, #tpu.memory_space<semaphore_mem>>
    tpu.wait_dma2 semaphore(%80 : memref<!tpu.dma_semaphore, #tpu.memory_space<semaphore_mem>>) src(%77 : memref<1x128xf32, #tpu.memory_space<any>>) dst(%78 : memref<1x128xf32, #tpu.memory_space<vmem>>)
    %c2_i32_57 = arith.constant 2 : i32
    %c0_i32_58 = arith.constant 0 : i32
    %c0_i32_59 = arith.constant 0 : i32
    %81 = tpu.memref_slice %arg2[%c0_i32_58, %c0_i32_59] : memref<256x128xf32, #tpu.memory_space<any>> -> memref<1x128xf32, #tpu.memory_space<any>>
    %c2_i32_60 = arith.constant 2 : i32
    %c0_i32_61 = arith.constant 0 : i32
    %82 = tpu.memref_slice %arg4[%c2_i32_60, %c0_i32_61] : memref<8x128xf32, #tpu.memory_space<vmem>> -> memref<1x128xf32, #tpu.memory_space<vmem>>
    %83 = tpu.memref_slice %arg5[%c2_i32_57] : memref<8x!tpu.dma_semaphore, #tpu.memory_space<semaphore_mem>> -> memref<1x!tpu.dma_semaphore, #tpu.memory_space<semaphore_mem>>
    %84 = tpu.memref_squeeze %83 : memref<1x!tpu.dma_semaphore, #tpu.memory_space<semaphore_mem>> -> memref<!tpu.dma_semaphore, #tpu.memory_space<semaphore_mem>>
    tpu.wait_dma2 semaphore(%84 : memref<!tpu.dma_semaphore, #tpu.memory_space<semaphore_mem>>) src(%81 : memref<1x128xf32, #tpu.memory_space<any>>) dst(%82 : memref<1x128xf32, #tpu.memory_space<vmem>>)
    %c3_i32_62 = arith.constant 3 : i32
    %c0_i32_63 = arith.constant 0 : i32
    %c0_i32_64 = arith.constant 0 : i32
    %85 = tpu.memref_slice %arg2[%c0_i32_63, %c0_i32_64] : memref<256x128xf32, #tpu.memory_space<any>> -> memref<1x128xf32, #tpu.memory_space<any>>
    %c3_i32_65 = arith.constant 3 : i32
    %c0_i32_66 = arith.constant 0 : i32
    %86 = tpu.memref_slice %arg4[%c3_i32_65, %c0_i32_66] : memref<8x128xf32, #tpu.memory_space<vmem>> -> memref<1x128xf32, #tpu.memory_space<vmem>>
    %87 = tpu.memref_slice %arg5[%c3_i32_62] : memref<8x!tpu.dma_semaphore, #tpu.memory_space<semaphore_mem>> -> memref<1x!tpu.dma_semaphore, #tpu.memory_space<semaphore_mem>>
    %88 = tpu.memref_squeeze %87 : memref<1x!tpu.dma_semaphore, #tpu.memory_space<semaphore_mem>> -> memref<!tpu.dma_semaphore, #tpu.memory_space<semaphore_mem>>
    tpu.wait_dma2 semaphore(%88 : memref<!tpu.dma_semaphore, #tpu.memory_space<semaphore_mem>>) src(%85 : memref<1x128xf32, #tpu.memory_space<any>>) dst(%86 : memref<1x128xf32, #tpu.memory_space<vmem>>)
    %c4_i32_67 = arith.constant 4 : i32
    %c0_i32_68 = arith.constant 0 : i32
    %c0_i32_69 = arith.constant 0 : i32
    %89 = tpu.memref_slice %arg2[%c0_i32_68, %c0_i32_69] : memref<256x128xf32, #tpu.memory_space<any>> -> memref<1x128xf32, #tpu.memory_space<any>>
    %c4_i32_70 = arith.constant 4 : i32
    %c0_i32_71 = arith.constant 0 : i32
    %90 = tpu.memref_slice %arg4[%c4_i32_70, %c0_i32_71] : memref<8x128xf32, #tpu.memory_space<vmem>> -> memref<1x128xf32, #tpu.memory_space<vmem>>
    %91 = tpu.memref_slice %arg5[%c4_i32_67] : memref<8x!tpu.dma_semaphore, #tpu.memory_space<semaphore_mem>> -> memref<1x!tpu.dma_semaphore, #tpu.memory_space<semaphore_mem>>
    %92 = tpu.memref_squeeze %91 : memref<1x!tpu.dma_semaphore, #tpu.memory_space<semaphore_mem>> -> memref<!tpu.dma_semaphore, #tpu.memory_space<semaphore_mem>>
    tpu.wait_dma2 semaphore(%92 : memref<!tpu.dma_semaphore, #tpu.memory_space<semaphore_mem>>) src(%89 : memref<1x128xf32, #tpu.memory_space<any>>) dst(%90 : memref<1x128xf32, #tpu.memory_space<vmem>>)
    %c5_i32_72 = arith.constant 5 : i32
    %c0_i32_73 = arith.constant 0 : i32
    %c0_i32_74 = arith.constant 0 : i32
    %93 = tpu.memref_slice %arg2[%c0_i32_73, %c0_i32_74] : memref<256x128xf32, #tpu.memory_space<any>> -> memref<1x128xf32, #tpu.memory_space<any>>
    %c5_i32_75 = arith.constant 5 : i32
    %c0_i32_76 = arith.constant 0 : i32
    %94 = tpu.memref_slice %arg4[%c5_i32_75, %c0_i32_76] : memref<8x128xf32, #tpu.memory_space<vmem>> -> memref<1x128xf32, #tpu.memory_space<vmem>>
    %95 = tpu.memref_slice %arg5[%c5_i32_72] : memref<8x!tpu.dma_semaphore, #tpu.memory_space<semaphore_mem>> -> memref<1x!tpu.dma_semaphore, #tpu.memory_space<semaphore_mem>>
    %96 = tpu.memref_squeeze %95 : memref<1x!tpu.dma_semaphore, #tpu.memory_space<semaphore_mem>> -> memref<!tpu.dma_semaphore, #tpu.memory_space<semaphore_mem>>
    tpu.wait_dma2 semaphore(%96 : memref<!tpu.dma_semaphore, #tpu.memory_space<semaphore_mem>>) src(%93 : memref<1x128xf32, #tpu.memory_space<any>>) dst(%94 : memref<1x128xf32, #tpu.memory_space<vmem>>)
    %c6_i32_77 = arith.constant 6 : i32
    %c0_i32_78 = arith.constant 0 : i32
    %c0_i32_79 = arith.constant 0 : i32
    %97 = tpu.memref_slice %arg2[%c0_i32_78, %c0_i32_79] : memref<256x128xf32, #tpu.memory_space<any>> -> memref<1x128xf32, #tpu.memory_space<any>>
    %c6_i32_80 = arith.constant 6 : i32
    %c0_i32_81 = arith.constant 0 : i32
    %98 = tpu.memref_slice %arg4[%c6_i32_80, %c0_i32_81] : memref<8x128xf32, #tpu.memory_space<vmem>> -> memref<1x128xf32, #tpu.memory_space<vmem>>
    %99 = tpu.memref_slice %arg5[%c6_i32_77] : memref<8x!tpu.dma_semaphore, #tpu.memory_space<semaphore_mem>> -> memref<1x!tpu.dma_semaphore, #tpu.memory_space<semaphore_mem>>
    %100 = tpu.memref_squeeze %99 : memref<1x!tpu.dma_semaphore, #tpu.memory_space<semaphore_mem>> -> memref<!tpu.dma_semaphore, #tpu.memory_space<semaphore_mem>>
    tpu.wait_dma2 semaphore(%100 : memref<!tpu.dma_semaphore, #tpu.memory_space<semaphore_mem>>) src(%97 : memref<1x128xf32, #tpu.memory_space<any>>) dst(%98 : memref<1x128xf32, #tpu.memory_space<vmem>>)
    %c7_i32_82 = arith.constant 7 : i32
    %c0_i32_83 = arith.constant 0 : i32
    %c0_i32_84 = arith.constant 0 : i32
    %101 = tpu.memref_slice %arg2[%c0_i32_83, %c0_i32_84] : memref<256x128xf32, #tpu.memory_space<any>> -> memref<1x128xf32, #tpu.memory_space<any>>
    %c7_i32_85 = arith.constant 7 : i32
    %c0_i32_86 = arith.constant 0 : i32
    %102 = tpu.memref_slice %arg4[%c7_i32_85, %c0_i32_86] : memref<8x128xf32, #tpu.memory_space<vmem>> -> memref<1x128xf32, #tpu.memory_space<vmem>>
    %103 = tpu.memref_slice %arg5[%c7_i32_82] : memref<8x!tpu.dma_semaphore, #tpu.memory_space<semaphore_mem>> -> memref<1x!tpu.dma_semaphore, #tpu.memory_space<semaphore_mem>>
    %104 = tpu.memref_squeeze %103 : memref<1x!tpu.dma_semaphore, #tpu.memory_space<semaphore_mem>> -> memref<!tpu.dma_semaphore, #tpu.memory_space<semaphore_mem>>
    tpu.wait_dma2 semaphore(%104 : memref<!tpu.dma_semaphore, #tpu.memory_space<semaphore_mem>>) src(%101 : memref<1x128xf32, #tpu.memory_space<any>>) dst(%102 : memref<1x128xf32, #tpu.memory_space<vmem>>)
    %c0 = arith.constant 0 : index
    %c0_87 = arith.constant 0 : index
    %105 = vector.load %arg4[%c0, %c0_87] : memref<8x128xf32, #tpu.memory_space<vmem>>, vector<8x128xf32>
    %cst = arith.constant 11.3137083 : f32
    %106 = vector.broadcast %cst : f32 to vector<8x128xf32>
    %107 = arith.mulf %105, %106 : vector<8x128xf32>
    %c0_88 = arith.constant 0 : index
    %c0_89 = arith.constant 0 : index
    %108 = vector.load %arg3[%c0_88, %c0_89] : memref<8x128xf32, #tpu.memory_space<vmem>>, vector<8x128xf32>
    tpu.vector_store %arg3[%c0_88, %c0_89], %107 {strides = array<i32>} : memref<8x128xf32, #tpu.memory_space<vmem>>, vector<8x128xf32>,
    return
  }
  func.func @transform_1(%arg0: i32, %arg1: memref<16xi32, #tpu.memory_space<smem>>) -> (i32, i32) {
    %c0_i32 = arith.constant 0 : i32
    %c0_i32_0 = arith.constant 0 : i32
    return %arg0, %c0_i32 : i32, i32
  }
}

</mosaic_0001>

<bundles_post_ra>
// kernel: tpu_custom_call.1
= control target key start
LH: loop header
LB: loop body
LE: loop exit
PB: predicated region body
PF: predicated region fallthrough
CT: control target
= control target key end

     0   :  { %s743_s9 = smov [#allocation5]   ;;  %s1007_s0 = inlined_call_operand.hbm [shape: s32[16], index: 0, kind: input, shape index: {}]   ;;  %s1008_s1 = inlined_call_operand.hbm [shape: f32[256,128], index: 1, kind: input, shape index: {}]   ;;  %s1009_s2 = inlined_call_operand.hbm [shape: f32[16,128], index: 2, kind: output, shape index: {}]  }
   0x1   :  { %8 = dma.hbm_to_smem %s1007_s0, 16, %s743_s9, [#allocation4] }
   0x2   :  { %709 = dma.done.wait [#allocation4], 16 }
   0x3   :  { %710 = vsyncadd [#allocation4], 4294967280 }
   0x4   :  { %10 = sfence }
   0x5   :  { %11 = vsyncpa [#allocation7], 0 }
   0x6   :  { %13 = vsyncpa [#allocation7 + $0x1], 0  ;;  %s771_s12 = smov 0   ;;  %s773_s13 = smov 0  }
   0x7   :  { %s775_s14 = smov 0  }
   0x8 LB: > { %s366_s0 = sadd.s32 4294967295, %s741_s14   ;;  %s788_s15 = sadd.s32 1, %s741_s14   ;;  %s741_s14 = sphi %s775_s14, %s1016_s14   ;;  %s737_s13 = sphi %s773_s13, %s1015_s13   ;;  %s733_s12 = sphi %s771_s12, %s1014_s12  }
   0x9   : > { %s22_s16 = ssub.s32 %s741_s14, %s788_s15  ;;  %s25_s17 = sadd.s32 1, %s737_s13 }
   0xa   : > { %p23_p0 = scmp.eq.s32.totalorder %s22_s16, 0  ;;  %p367_p1 = scmp.ne.s32.totalorder %s22_s16, 0 }
   0xb   : > { %p29_p2 = scmp.eq.s32.totalorder %s741_s14, 1  ;;  %p34_p3 = scmp.ne.s32.totalorder %s737_s13, %s733_s12 }
   0xc   : > { %s797_s18 = scalar_select %p23_p0, %s737_s13, %s25_s17  }
   0xd   : > { %p799_p4 = por %p367_p1, %p29_p2  ;;  %p35_p5 = scmp.eq.s32.totalorder %s366_s0, 1 }
   0xe   : > { %p368_p7 = scmp.ge.s32.totalorder %s741_s14, 2 }
   0xf   : > { %p803_p6 = por %p35_p5, %p34_p3  ;;  %s49_s21 = sand.u32 (!%p368_p7), 1, %s737_s13  }
  0x10   : > { %44 = sbr.rel (%p368_p7) target bundleno = 248 (0xf8), region = 12  ;;  %s810_s22 = sshll.u32 (!%p368_p7), %s741_s14, 3 }
  0x11   : > { %s814_s23 = sshll.u32 (!%p368_p7), %s49_s21, 3  ;;  %s53_s24 = sld [smem:[#allocation5 + %s810_s22]] (!%p368_p7) }
  0x12   : > { %s744_s25 = smov (!%p368_p7), [#allocation2]   ;;  %s71_s27 = sadd.s32 (!%p368_p7), 1, %s810_s22 }
  0x13   : > { %s67_s26 = sshll.u32 (!%p368_p7), %s744_s25, 4  ;;  %s820_s28 = sld [smem:[#allocation5 + %s71_s27]] (!%p368_p7)  ;;  %s818_s26 = int_to_ptr.vmem [resolvable:$true] %s67_s26 }
  0x14   : > { %s92_s29 = sadd.s32 (!%p368_p7), 2, %s810_s22  ;;  %s745_s30 = smov (!%p368_p7), [#allocation2 + $0x1]  }
  0x15   : > { %s88_s3 = sshll.u32 %s745_s30, 4  ;;  %s823_s4 = sld [smem:[#allocation5 + %s92_s29]]  ;;  %s825_s3 = int_to_ptr.vmem [resolvable:$true] %s88_s3 }
  0x16   : > { %s838_s16 = scalar_lea.hbm %s1008_s1, 4096 }
  0x17   : > { %p54_p8 = scmp.gt.s32.totalorder %s53_s24, 0  ;;  %p371_p9 = scmp.lt.s32.totalorder %s53_s24, 255 }
  0x19   : > { %s1018_s24 = smov (!%p54_p8, %s53_s24), 0  ;;  %p73_p10 = scmp.gt.s32.totalorder %s820_s28, 0 }
  0x1a   : > { %p377_p11 = scmp.lt.s32.totalorder %s820_s28, 255  ;;  %s1020_s24 = smov (!%p371_p9, %s1018_s24), 255 }
  0x1b   : > { %s74_s5 = scalar_select %p73_p10, %s820_s28, 0 }
  0x1c   : > { %s376_s6 = sshll.u32 %s1020_s24, 4  ;;  %p94_p12 = scmp.gt.s32.totalorder %s823_s4, 0 }
  0x1d   : > { %s59_s9 = scalar_lea.hbm %s1008_s1, %s376_s6 }
  0x1e   : > { %s495_s10 = scalar_lea.hbm %s59_s9, 16  ;;  %p498_p1 = scmp.lt.s32.totalorder %s59_s9, %s1008_s1 }
  0x1f   : > { %p496_p0 = scmp.ne.s32.totalorder %s59_s9, %s495_s10  ;;  %p499_p2 = scmp.lt.s32.totalorder %s838_s16, %s495_s10 }
  0x21   : > { %p500_p3 = por %p499_p2, %p498_p1 }
  0x23   : > { %p501_p5 = pnand %p500_p3, %p496_p0 }
  0x25   : > { %504 = shalt.err (!%p501_p5)  }
  0x26   : > { %s505_s24 = scalar_lea.vmem %s818_s26, 16  ;;  %s847_s27 = scalar_lea.vmem %s818_s26, 128 }
  0x27   : > { %p506_p7 = scmp.ne.s32.totalorder %s818_s26, %s505_s24  ;;  %p510_p8 = scmp.lt.s32.totalorder %s818_s26, %s818_s26 }
  0x28   : > { %p511_p9 = scmp.lt.s32.totalorder %s847_s27, %s505_s24 }
  0x2a   : > { %p512_p10 = por %p511_p9, %p510_p8 }
  0x2c   : > { %p513_p13 = pnand %p512_p10, %p506_p7 }
  0x2e   : > { %516 = shalt.err (!%p513_p13)  }
  0x2f   : > { %70 = dma.hbm_to_vmem [thread:$0]  %s59_s9, 16, %s818_s26, [#allocation3] }
  0x30   : > { %s1022_s5 = smov (!%p377_p11, %s74_s5), 255  ;;  %s746_s6 = smov [#allocation2 + $0x2]  }
  0x31   : > { %s95_s29 = scalar_select %p94_p12, %s823_s4, 0 }
  0x32   : > { %s382_s30 = sshll.u32 %s1022_s5, 4  ;;  %s109_s7 = sshll.u32 %s746_s6, 4  ;;  %s861_s7 = int_to_ptr.vmem [resolvable:$true] %s109_s7 }
  0x33   : > { %s78_s11 = scalar_lea.hbm %s1008_s1, %s382_s30 }
  0x34   : > { %s517_s0 = scalar_lea.hbm %s78_s11, 16  ;;  %p520_p0 = scmp.lt.s32.totalorder %s78_s11, %s1008_s1 }
  0x35   : > { %p518_p13 = scmp.ne.s32.totalorder %s78_s11, %s517_s0  ;;  %p521_p1 = scmp.lt.s32.totalorder %s838_s16, %s517_s0 }
  0x37   : > { %p522_p2 = por %p521_p1, %p520_p0 }
  0x39   : > { %p523_p11 = pnand %p522_p2, %p518_p13 }
  0x3b   : > { %526 = shalt.err (!%p523_p11)  }
  0x3c   : > { %s527_s28 = scalar_lea.vmem %s825_s3, 16  ;;  %p532_p3 = scmp.lt.s32.totalorder %s825_s3, %s818_s26 }
  0x3d   : > { %p528_p12 = scmp.ne.s32.totalorder %s825_s3, %s527_s28  ;;  %p533_p5 = scmp.lt.s32.totalorder %s847_s27, %s527_s28 }
  0x3f   : > { %p534_p7 = por %p533_p5, %p532_p3 }
  0x41   : > { %p535_p8 = pnand %p534_p7, %p528_p12 }
  0x43   : > { %538 = shalt.err (!%p535_p8)  }
  0x44   : > { %91 = dma.hbm_to_vmem [thread:$0]  %s78_s11, 16, %s825_s3, [#allocation3 + $0x1] }
  0x45   : > { %p1012_p9 = scmp.lt.s32.totalorder %s823_s4, 255  ;;  %s113_s5 = sadd.s32 3, %s810_s22 }
  0x46   : > { %s876_s24 = sld [smem:[#allocation5 + %s113_s5]] }
  0x47   : > { %s1024_s29 = smov (!%p1012_p9, %s95_s29), 255 }
  0x48   : > { %s388_s9 = sshll.u32 %s1024_s29, 4 }
  0x49   : > { %s99_s8 = scalar_lea.hbm %s1008_s1, %s388_s9 }
  0x4a   : > { %s539_s10 = scalar_lea.hbm %s99_s8, 16  ;;  %p542_p13 = scmp.lt.s32.totalorder %s99_s8, %s1008_s1 }
  0x4b   : > { %p540_p10 = scmp.ne.s32.totalorder %s99_s8, %s539_s10  ;;  %p543_p0 = scmp.lt.s32.totalorder %s838_s16, %s539_s10 }
  0x4d   : > { %p544_p1 = por %p543_p0, %p542_p13 }
  0x4f   : > { %p545_p2 = pnand %p544_p1, %p540_p10 }
  0x51   : > { %548 = shalt.err (!%p545_p2)  }
  0x52   : > { %s549_s3 = scalar_lea.vmem %s861_s7, 16  ;;  %p554_p12 = scmp.lt.s32.totalorder %s861_s7, %s818_s26 }
  0x53   : > { %p550_p11 = scmp.ne.s32.totalorder %s861_s7, %s549_s3  ;;  %p555_p3 = scmp.lt.s32.totalorder %s847_s27, %s549_s3 }
  0x55   : > { %p556_p5 = por %p555_p3, %p554_p12 }
  0x57   : > { %p557_p7 = pnand %p556_p5, %p550_p11 }
  0x59   : > { %560 = shalt.err (!%p557_p7)  }
  0x5a   : > { %112 = dma.hbm_to_vmem [thread:$0]  %s99_s8, 16, %s861_s7, [#allocation3 + $0x2] }
  0x5b   : > { %s747_s4 = smov [#allocation2 + $0x3]   ;;  %s134_s11 = sadd.s32 4, %s810_s22 }
  0x5c   : > { %s130_s29 = sshll.u32 %s747_s4, 4  ;;  %s892_s25 = sld [smem:[#allocation5 + %s134_s11]]  ;;  %s131_s29 = int_to_ptr.vmem [resolvable:$true] %s130_s29 }
  0x5d   : > { %s748_s28 = smov [#allocation2 + $0x4]   ;;  %s155_s9 = sadd.s32 5, %s810_s22 }
  0x5e   : > { %s151_s5 = sshll.u32 %s748_s28, 4  ;;  %p115_p8 = scmp.gt.s32.totalorder %s876_s24, 0  ;;  %s900_s5 = int_to_ptr.vmem [resolvable:$true] %s151_s5 }
  0x5f   : > { %p389_p9 = scmp.lt.s32.totalorder %s876_s24, 255  ;;  %s897_s30 = sld [smem:[#allocation5 + %s155_s9]] }
  0x60   : > { %s1026_s24 = smov (!%p115_p8, %s876_s24), 0  ;;  %s176_s7 = sadd.s32 6, %s810_s22 }
  0x61   : > { %s1028_s24 = smov (!%p389_p9, %s1026_s24), 255 }
  0x62   : > { %p136_p10 = scmp.gt.s32.totalorder %s892_s25, 0  ;;  %s394_s6 = sshll.u32 %s1028_s24, 4 }
  0x63   : > { %s120_s0 = scalar_lea.hbm %s1008_s1, %s394_s6 }
  0x64   : > { %s561_s17 = scalar_lea.hbm %s120_s0, 16  ;;  %p564_p2 = scmp.lt.s32.totalorder %s120_s0, %s1008_s1 }
  0x65   : > { %p157_p0 = scmp.gt.s32.totalorder %s897_s30, 0  ;;  %p562_p1 = scmp.ne.s32.totalorder %s120_s0, %s561_s17 }
  0x66   : > { %p565_p11 = scmp.lt.s32.totalorder %s838_s16, %s561_s17 }
  0x68   : > { %p566_p12 = por %p565_p11, %p564_p2 }
  0x6a   : > { %p567_p3 = pnand %p566_p12, %p562_p1 }
  0x6c   : > { %570 = shalt.err (!%p567_p3)  }
  0x6d   : > { %s571_s11 = scalar_lea.vmem %s131_s29, 16  ;;  %p576_p7 = scmp.lt.s32.totalorder %s131_s29, %s818_s26 }
  0x6e   : > { %p572_p5 = scmp.ne.s32.totalorder %s131_s29, %s571_s11  ;;  %p577_p8 = scmp.lt.s32.totalorder %s847_s27, %s571_s11 }
  0x70   : > { %p578_p9 = por %p577_p8, %p576_p7 }
  0x72   : > { %p579_p13 = pnand %p578_p9, %p572_p5 }
  0x74   : > { %582 = shalt.err (!%p579_p13)  }
  0x75   : > { %133 = dma.hbm_to_vmem [thread:$0]  %s120_s0, 16, %s131_s29, [#allocation3 + $0x3] }
  0x76   : > { %s137_s24 = scalar_select %p136_p10, %s892_s25, 0 }
  0x77   : > { %s158_s28 = scalar_select %p157_p0, %s897_s30, 0 }
  0x78   : > { %p1013_p1 = scmp.lt.s32.totalorder %s892_s25, 255  ;;  %p401_p2 = scmp.lt.s32.totalorder %s897_s30, 255 }
  0x79   : > { %s749_s9 = smov [#allocation2 + $0x5]   ;;  %s924_s10 = sld [smem:[#allocation5 + %s176_s7]] }
  0x7a   : > { %s1030_s24 = smov (!%p1013_p1, %s137_s24), 255  ;;  %s172_s6 = sshll.u32 %s749_s9, 4  ;;  %s173_s6 = int_to_ptr.vmem [resolvable:$true] %s172_s6 }
  0x7b   : > { %s400_s8 = sshll.u32 %s1030_s24, 4 }
  0x7c   : > { %s141_s17 = scalar_lea.hbm %s1008_s1, %s400_s8 }
  0x7d   : > { %s583_s3 = scalar_lea.hbm %s141_s17, 16  ;;  %p586_p10 = scmp.lt.s32.totalorder %s141_s17, %s1008_s1 }
  0x7e   : > { %p584_p13 = scmp.ne.s32.totalorder %s141_s17, %s583_s3  ;;  %p587_p11 = scmp.lt.s32.totalorder %s838_s16, %s583_s3 }
  0x80   : > { %p588_p0 = por %p587_p11, %p586_p10 }
  0x82   : > { %p589_p12 = pnand %p588_p0, %p584_p13 }
  0x84   : > { %592 = shalt.err (!%p589_p12)  }
  0x85   : > { %s593_s25 = scalar_lea.vmem %s900_s5, 16  ;;  %p598_p5 = scmp.lt.s32.totalorder %s900_s5, %s818_s26 }
  0x86   : > { %p594_p3 = scmp.ne.s32.totalorder %s900_s5, %s593_s25  ;;  %p599_p7 = scmp.lt.s32.totalorder %s847_s27, %s593_s25 }
  0x88   : > { %p600_p8 = por %p599_p7, %p598_p5 }
  0x8a   : > { %p601_p9 = pnand %p600_p8, %p594_p3 }
  0x8c   : > { %604 = shalt.err (!%p601_p9)  }
  0x8d   : > { %154 = dma.hbm_to_vmem [thread:$0]  %s141_s17, 16, %s900_s5, [#allocation3 + $0x4] }
  0x8e   : > { %s1032_s28 = smov (!%p401_p2, %s158_s28), 255  ;;  %s750_s7 = smov [#allocation2 + $0x6]  }
  0x8f   : > { %s193_s24 = sshll.u32 %s750_s7, 4  ;;  %s406_s9 = sshll.u32 %s1032_s28, 4  ;;  %s194_s24 = int_to_ptr.vmem [resolvable:$true] %s193_s24 }
  0x90   : > { %s197_s8 = sadd.s32 7, %s810_s22  ;;  %s162_s3 = scalar_lea.hbm %s1008_s1, %s406_s9 }
  0x91   : > { %p178_p1 = scmp.gt.s32.totalorder %s924_s10, 0  ;;  %s605_s4 = scalar_lea.hbm %s162_s3, 16 }
  0x92   : > { %p606_p13 = scmp.ne.s32.totalorder %s162_s3, %s605_s4  ;;  %p608_p10 = scmp.lt.s32.totalorder %s162_s3, %s1008_s1 }
  0x93   : > { %p609_p11 = scmp.lt.s32.totalorder %s838_s16, %s605_s4 }
  0x95   : > { %p610_p0 = por %p609_p11, %p608_p10 }
  0x97   : > { %p611_p12 = pnand %p610_p0, %p606_p13 }
  0x99   : > { %614 = shalt.err (!%p611_p12)  }
  0x9a   : > { %s615_s5 = scalar_lea.vmem %s173_s6, 16  ;;  %p620_p3 = scmp.lt.s32.totalorder %s173_s6, %s818_s26 }
  0x9b   : > { %p616_p2 = scmp.ne.s32.totalorder %s173_s6, %s615_s5  ;;  %p621_p5 = scmp.lt.s32.totalorder %s847_s27, %s615_s5 }
  0x9d   : > { %p622_p7 = por %p621_p5, %p620_p3 }
  0x9f   : > { %p623_p8 = pnand %p622_p7, %p616_p2 }
  0xa1   : > { %626 = shalt.err (!%p623_p8)  }
  0xa2   : > { %175 = dma.hbm_to_vmem [thread:$0]  %s162_s3, 16, %s173_s6, [#allocation3 + $0x5] }
  0xa3   : > { %s179_s22 = scalar_select %p178_p1, %s924_s10, 0 }
  0xa4   : > { %p407_p9 = scmp.lt.s32.totalorder %s924_s10, 255  ;;  %s198_s30 = sld [smem:[#allocation5 + %s197_s8]] }
  0xa6   : > { %s1034_s22 = smov (!%p407_p9, %s179_s22), 255 }
  0xa7   : > { %s412_s28 = sshll.u32 %s1034_s22, 4 }
  0xa8   : > { %s183_s9 = scalar_lea.hbm %s1008_s1, %s412_s28 }
  0xa9   : > { %s627_s29 = scalar_lea.hbm %s183_s9, 16  ;;  %p630_p10 = scmp.lt.s32.totalorder %s183_s9, %s1008_s1 }
  0xaa   : > { %p628_p13 = scmp.ne.s32.totalorder %s183_s9, %s627_s29  ;;  %p631_p11 = scmp.lt.s32.totalorder %s838_s16, %s627_s29 }
  0xac   : > { %p632_p0 = por %p631_p11, %p630_p10 }
  0xae   : > { %p633_p12 = pnand %p632_p0, %p628_p13 }
  0xb0   : > { %636 = shalt.err (!%p633_p12)  }
  0xb1   : > { %s637_s6 = scalar_lea.vmem %s194_s24, 16  ;;  %p642_p2 = scmp.lt.s32.totalorder %s194_s24, %s818_s26 }
  0xb2   : > { %p638_p1 = scmp.ne.s32.totalorder %s194_s24, %s637_s6  ;;  %p643_p3 = scmp.lt.s32.totalorder %s847_s27, %s637_s6 }
  0xb4   : > { %p644_p5 = por %p643_p3, %p642_p2 }
  0xb6   : > { %p645_p7 = pnand %p644_p5, %p638_p1 }
  0xb8   : > { %648 = shalt.err (!%p645_p7)  }
  0xb9   : > { %196 = dma.hbm_to_vmem [thread:$0]  %s183_s9, 16, %s194_s24, [#allocation3 + $0x6] }
  0xba   : > { %p199_p8 = scmp.gt.s32.totalorder %s198_s30, 0  ;;  %p413_p9 = scmp.lt.s32.totalorder %s198_s30, 255 }
  0xbb   : > { %s751_s10 = smov [#allocation2 + $0x7]  }
  0xbc   : > { %s214_s8 = sshll.u32 %s751_s10, 4  ;;  %s1036_s30 = smov (!%p199_p8, %s198_s30), 0  ;;  %s215_s8 = int_to_ptr.vmem [resolvable:$true] %s214_s8 }
  0xbd   : > { %s1038_s30 = smov (!%p413_p9, %s1036_s30), 255 }
  0xbe   : > { %s418_s3 = sshll.u32 %s1038_s30, 4 }
  0xbf   : > { %s204_s5 = scalar_lea.hbm %s1008_s1, %s418_s3 }
  0xc0   : > { %s649_s22 = scalar_lea.hbm %s204_s5, 16  ;;  %p652_p10 = scmp.lt.s32.totalorder %s204_s5, %s1008_s1 }
  0xc1   : > { %p650_p13 = scmp.ne.s32.totalorder %s204_s5, %s649_s22  ;;  %p653_p11 = scmp.lt.s32.totalorder %s838_s16, %s649_s22 }
  0xc3   : > { %p654_p0 = por %p653_p11, %p652_p10 }
  0xc5   : > { %p655_p12 = pnand %p654_p0, %p650_p13 }
  0xc7   : > { %658 = shalt.err (!%p655_p12)  }
  0xc8   : > { %s659_s24 = scalar_lea.vmem %s215_s8, 16  ;;  %p664_p2 = scmp.lt.s32.totalorder %s215_s8, %s818_s26 }
  0xc9   : > { %p660_p1 = scmp.ne.s32.totalorder %s215_s8, %s659_s24  ;;  %p665_p3 = scmp.lt.s32.totalorder %s847_s27, %s659_s24 }
  0xcb   : > { %p666_p5 = por %p665_p3, %p664_p2 }
  0xcd   : > { %p667_p7 = pnand %p666_p5, %p660_p1 }
  0xcf   : > { %670 = shalt.err (!%p667_p7)  }
  0xd0   : > { %217 = dma.hbm_to_vmem [thread:$0]  %s204_s5, 16, %s215_s8, [#allocation3 + $0x7] }
  0xd1   : > { %s51_s30 = scalar_lea.vmem [#allocation6], %s814_s23 }
  0xd2   : > { %711 = dma.done.wait [#allocation3], 16 }
  0xd3   : > { %712 = vsyncadd [#allocation3], 4294967280 }
  0xd4   : > { %713 = dma.done.wait [#allocation3 + $0x1], 16 }
  0xd5   : > { %714 = vsyncadd [#allocation3 + $0x1], 4294967280 }
  0xd6   : > { %715 = dma.done.wait [#allocation3 + $0x2], 16 }
  0xd7   : > { %716 = vsyncadd [#allocation3 + $0x2], 4294967280 }
  0xd8   : > { %717 = dma.done.wait [#allocation3 + $0x3], 16 }
  0xd9   : > { %718 = vsyncadd [#allocation3 + $0x3], 4294967280 }
  0xda   : > { %719 = dma.done.wait [#allocation3 + $0x4], 16 }
  0xdb   : > { %720 = vsyncadd [#allocation3 + $0x4], 4294967280 }
  0xdc   : > { %721 = dma.done.wait [#allocation3 + $0x5], 16 }
  0xdd   : > { %722 = vsyncadd [#allocation3 + $0x5], 4294967280 }
  0xde   : > { %723 = dma.done.wait [#allocation3 + $0x6], 16 }
  0xdf   : > { %724 = vsyncadd [#allocation3 + $0x6], 4294967280 }
  0xe0   : > { %725 = dma.done.wait [#allocation3 + $0x7], 16 }
  0xe1   : > { %726 = vsyncadd [#allocation3 + $0x7], 4294967280  ;;  %s420_s23 = sshll.u32 %s741_s14, 7  ;;  %s252_s26 = sshll.u32 %s51_s30, 4  ;;  %v235_v0 = vld [vmem:[#allocation2] sm:$0xff]  ;;  %s253_s26 = int_to_ptr.vmem [resolvable:$true] %s252_s26 }
  0xe2   : > { %v236_v1 = vmul.f32 11.313708, %v235_v0  ;;  %s250_s7 = scalar_lea.hbm %s1009_s2, %s420_s23  ;;  %s239_s9 = scalar_lea.sflag [#allocation7], %s49_s21 }
  0xe3   : > { %s671_s29 = scalar_lea.vmem %s253_s26, 128  ;;  %s752_s0 = smov [#allocation6]  }
  0xe4   : > { %237 = vst [vmem:[%s51_s30] sm:$0xff] %v236_v1  ;;  %p672_p8 = scmp.ne.s32.totalorder %s253_s26, %s671_s29  ;;  %s675_s4 = sshll.u32 %s752_s0, 4  ;;  %s676_s4 = int_to_ptr.vmem [resolvable:$false] %s675_s4 }
  0xe5   : > { %s677_s6 = scalar_lea.vmem %s676_s4, 256  ;;  %p678_p10 = scmp.lt.s32.totalorder %s253_s26, %s676_s4 }
  0xe6   : > { %p673_p9 = pnand %p672_p8, %p799_p4  ;;  %p679_p11 = scmp.lt.s32.totalorder %s677_s6, %s671_s29 }
  0xe8   : > { %p674_p13 = pneg %p673_p9  ;;  %p680_p0 = por %p679_p11, %p678_p10 }
  0xea   : > { %p681_p12 = pnand %p680_p0, %p674_p13 }
  0xec   : > { %684 = shalt.err (!%p681_p12)
}
  0xed   : > { %s685_s10 = scalar_lea.hbm %s250_s7, 128  ;;  %s689_s3 = scalar_lea.hbm %s1009_s2, 256 }
  0xee   : > { %p686_p1 = scmp.ne.s32.totalorder %s250_s7, %s685_s10  ;;  %p690_p5 = scmp.lt.s32.totalorder %s250_s7, %s1009_s2 }
  0xef   : > { %p691_p7 = scmp.lt.s32.totalorder %s689_s3, %s685_s10 }
  0xf0   : > { %p687_p2 = pnand %p686_p1, %p799_p4 }
  0xf1   : > { %p692_p8 = por %p691_p7, %p690_p5 }
  0xf2   : > { %p688_p3 = pneg %p687_p2 }
  0xf4   : > { %p693_p9 = pnand %p692_p8, %p688_p3 }
  0xf6   : > { %696 = shalt.err (!%p693_p9)
}
  0xf7   : > { %447 = dma.vmem_to_hbm [thread:$0]  (%p799_p4), %s253_s26, 128, %s250_s7, %s239_s9  }
  0xf8 PF: > { %p453_p13 = scmp.ge.s32.totalorder %s741_s14, 1  ;;  %s264_s5 = sand.u32 1, %s733_s12  }
  0xf9   : > { %s265_s22 = scalar_lea.sflag [#allocation7], %s264_s5 }
  0xfa   : > { %p450_p10 = pnand %p453_p13, %p803_p6 }
  0xfc   : > { %p451_p11 = pneg %p450_p10 }
  0xfe   : > { %728 = dma.done.wait (%p451_p11), %s265_s22, 128  }
  0xff   : > { %730 = vsyncadd (%p451_p11), %s265_s22, 4294967168  ;;  %p16_p0 = scmp.ge.s32.totalorder %s788_s15, 3   ;;  %s1014_s12 = smov %s737_s13 }
 0x100   : > { %s1015_s13 = smov %s797_s18  ;;  %s1016_s14 = smov %s788_s15 }
 0x101   :  { %18 = sbr.rel (!%p16_p0) target bundleno = 8 (0x8), region = 105 }
 0x106   :  { %270 = vsyncpa [#allocation7], 1 }
 0x107   :  { %272 = vsyncpa [#allocation7 + $0x1], 1 }
 0x108   :  { %273 = vsyncmov [#allocation3] }
 0x10b   :  { %s274_s14 = vpop.sfrf %273 }
 0x10c   :  { %p423_p4 = scmp.ne.s32.totalorder %s274_s14, 0 }
 0x10e   :  { %278 = shalt.err (%p423_p4)  }
 0x10f   :  { %280 = vsyncmov [#allocation3 + $0x1] }
 0x112   :  { %s281_s19 = vpop.sfrf %280 }
 0x113   :  { %p424_p6 = scmp.ne.s32.totalorder %s281_s19, 0 }
 0x115   :  { %285 = shalt.err (%p424_p6)  }
 0x116   :  { %287 = vsyncmov [#allocation3 + $0x2] }
 0x119   :  { %s288_s20 = vpop.sfrf %287 }
 0x11a   :  { %p425_p12 = scmp.ne.s32.totalorder %s288_s20, 0 }
 0x11c   :  { %292 = shalt.err (%p425_p12)  }
 0x11d   :  { %294 = vsyncmov [#allocation3 + $0x3] }
 0x120   :  { %s295_s28 = vpop.sfrf %294 }
 0x121   :  { %p426_p1 = scmp.ne.s32.totalorder %s295_s28, 0 }
 0x123   :  { %299 = shalt.err (%p426_p1)  }
 0x124   :  { %301 = vsyncmov [#allocation3 + $0x4] }
 0x127   :  { %s302_s15 = vpop.sfrf %301 }
 0x128   :  { %p427_p2 = scmp.ne.s32.totalorder %s302_s15, 0 }
 0x12a   :  { %306 = shalt.err (%p427_p2)  }
 0x12b   :  { %308 = vsyncmov [#allocation3 + $0x5] }
 0x12e   :  { %s309_s1 = vpop.sfrf %308 }
 0x12f   :  { %p428_p3 = scmp.ne.s32.totalorder %s309_s1, 0 }
 0x131   :  { %313 = shalt.err (%p428_p3)  }
 0x132   :  { %315 = vsyncmov [#allocation3 + $0x6] }
 0x135   :  { %s316_s2 = vpop.sfrf %315 }
 0x136   :  { %p429_p5 = scmp.ne.s32.totalorder %s316_s2, 0 }
 0x138   :  { %320 = shalt.err (%p429_p5)  }
 0x139   :  { %322 = vsyncmov [#allocation3 + $0x7] }
 0x13c   :  { %s323_s12 = vpop.sfrf %322 }
 0x13d   :  { %p430_p7 = scmp.ne.s32.totalorder %s323_s12, 0 }
 0x13f   :  { %327 = shalt.err (%p430_p7)  }

</bundles_post_ra>
